<compile_context>
chip_gen: v7x
topology: tpu7x:2x2x1
jax: 0.10.0
libtpu: 0.0.40
codegen_flags: <defaults>
</compile_context>

<pallas_src>
import jax
import jax.numpy as jnp
from jax.experimental import pallas as pl
from jax.experimental.pallas import tpu as pltpu

_LANES = 128            # lane width of a vreg (minor tile dim)
_SUBLANES = 8           # f32 sublane count (second-minor tile dim)
_MAX_BLOCK_ROWS = 2048  # (8,128)-rows per grid step -> 256K batch rows / ~6 MiB per step
_MIN_GRID_STEPS = 4     # keep the parallel axis splittable across v7x's 2 TensorCores


def _affine_kernel(x_ref, w_ref, b_ref, o_ref):
    """y = x @ W_eff + b_eff, feature-major, batch on sublane+lane axes.

    x_ref: [in_f,  ROWS, 128] VMEM   input tile
    w_ref: [in_f,  out_f]     SMEM   fused weight scalars
    b_ref: [1,     out_f]     SMEM   fused bias scalars
    o_ref: [out_f, ROWS, 128] VMEM   output tile
    """
    in_f = x_ref.shape[0]
    out_f = o_ref.shape[0]
    for o in range(out_f):                 # static unroll (out_f == 4)
        acc = x_ref[0] * w_ref[0, o] + b_ref[0, o]
        for k in range(1, in_f):           # static unroll (in_f == 2)
            acc = acc + x_ref[k] * w_ref[k, o]
        o_ref[o] = acc


@jax.jit
def blobs_forward(x, params):
    """x: [batch, in_features] float32 -> [batch, out_features] float32."""
    # --- Fuse the activation-free 3-layer MLP into a single affine map. ---
    w_eff = params["w1"] @ params["w2"] @ params["w3"]                      # [in_f, out_f]
    b_eff = (params["b1"] @ params["w2"] + params["b2"]) @ params["w3"] \
            + params["b3"]                                                  # [1, out_f]

    batch, in_f = x.shape
    out_f = w_eff.shape[1]

    # Pad the batch only to a multiple of 128 (the lane width); the ragged
    # last tile (if any) is handled by the cdiv grid, not by extra padding.
    padded = pl.cdiv(batch, _LANES) * _LANES
    nblk = padded // _LANES                      # number of (., 128) rows

    if nblk <= _SUBLANES:
        rows = nblk                              # single full-extent block
    else:
        rows = min(_MAX_BLOCK_ROWS, pl.cdiv(nblk, _MIN_GRID_STEPS))
        rows = max(_SUBLANES, (rows // _SUBLANES) * _SUBLANES)   # dense (8,128) tiles
    grid = (pl.cdiv(nblk, rows),)

    # Feature-major, sublane+lane dense relayout: [batch, in_f] -> [in_f, nblk, 128].
    x_p = x if padded == batch else jnp.pad(x, ((0, padded - batch), (0, 0)))
    x_fm = x_p.reshape(nblk, _LANES, in_f).transpose(2, 0, 1)

    y_fm = pl.pallas_call(
        _affine_kernel,
        out_shape=jax.ShapeDtypeStruct((out_f, nblk, _LANES), jnp.float32),
        grid_spec=pltpu.PrefetchScalarGridSpec(
            num_scalar_prefetch=0,
            grid=grid,
            in_specs=[
                pl.BlockSpec((in_f, rows, _LANES), lambda i: (0, i, 0)),   # x tile
                pl.BlockSpec(memory_space=pltpu.MemorySpace.SMEM),         # W_eff scalars
                pl.BlockSpec(memory_space=pltpu.MemorySpace.SMEM),         # b_eff scalars
            ],
            out_specs=pl.BlockSpec((out_f, rows, _LANES), lambda i: (0, i, 0)),
        ),
        compiler_params=pltpu.CompilerParams(
            dimension_semantics=("parallel",),      # batch axis -> megacore-splittable
            vmem_limit_bytes=32 * 1024 * 1024,      # ~12 MiB used; fits v5e/v6e/v7x
        ),
    )(x_fm, w_eff.astype(jnp.float32), b_eff.astype(jnp.float32))

    # Back to the PyTorch [batch, out_features] interface.
    return y_fm.transpose(1, 2, 0).reshape(padded, out_f)[:batch]


def init_params(key, in_features=2, hidden_units=8, out_features=4):
    """Deterministic PyTorch-style (Kaiming-uniform-ish) init."""
    def linear(k, fan_in, fan_out):
        k_w, k_b = jax.random.split(k)
        bound = 1.0 / jnp.sqrt(jnp.float32(fan_in))
        # stored as [in, out] (transposed relative to torch's [out, in])
        w = jax.random.uniform(k_w, (fan_in, fan_out), jnp.float32, -bound, bound)
        b = jax.random.uniform(k_b, (1, fan_out), jnp.float32, -bound, bound)
        return w, b

    k1, k2, k3 = jax.random.split(key, 3)
    w1, b1 = linear(k1, in_features, hidden_units)
    w2, b2 = linear(k2, hidden_units, hidden_units)
    w3, b3 = linear(k3, hidden_units, out_features)
    return {"w1": w1, "b1": b1, "w2": w2, "b2": b2, "w3": w3, "b3": b3}


def _reference(x, p):
    h1 = x @ p["w1"] + p["b1"]
    h2 = h1 @ p["w2"] + p["b2"]
    return h2 @ p["w3"] + p["b3"]


if __name__ == "__main__":
    key = jax.random.PRNGKey(0)
    k_params, kx1, kx2, kx3 = jax.random.split(key, 4)

    in_features, hidden_units, out_features = 2, 8, 4
    params = init_params(k_params, in_features, hidden_units, out_features)

    # (batch, rng): small single-block, multi-block even split, ragged last block.
    cases = [(8, kx1), (2000, kx2), (1200, kx3)]
    for batch, kx in cases:
        x = jax.random.normal(kx, (batch, in_features), jnp.float32)
        y = blobs_forward(x, params)
        jax.block_until_ready(y)
        y_ref = _reference(x, params)
        assert y.shape == (batch, out_features)
        assert jnp.allclose(y, y_ref, atol=1e-5, rtol=1e-5), f"mismatch at batch={batch}"

    print("KERNEL_OK")
</pallas_src>

<mosaic_0001>
module attributes {stable_mosaic.version = 11 : i64} {
  func.func @_affine_kernel(%arg0: i32, %arg1: memref<2x1x128xf32, #tpu.memory_space<vmem>>, %arg2: memref<2x4xf32, #tpu.memory_space<smem>>, %arg3: memref<1x4xf32, #tpu.memory_space<smem>>, %arg4: memref<4x1x128xf32, #tpu.memory_space<vmem>>) attributes {dimension_semantics = [#tpu.dimension_semantics<parallel>], iteration_bounds = array<i64: 1>, scalar_prefetch = 0 : i64, scratch_operands = 0 : i64, tpu.core_type = #tpu.core_type<tc>, window_params = [{transform_indices = @transform_0, window_bounds = array<i64: 2, 1, 128>}, {transform_indices = @transform_1, window_bounds = array<i64: 2, 4>}, {transform_indices = @transform_2, window_bounds = array<i64: 1, 4>}, {transform_indices = @transform_3, window_bounds = array<i64: 4, 1, 128>}]} {
    %c0 = arith.constant 0 : index
    %c0_0 = arith.constant 0 : index
    %c0_1 = arith.constant 0 : index
    %0 = vector.load %arg1[%c0, %c0_0, %c0_1] : memref<2x1x128xf32, #tpu.memory_space<vmem>>, vector<1x1x128xf32>
    %1 = vector.shape_cast %0 : vector<1x1x128xf32> to vector<1x128xf32>
    %c0_2 = arith.constant 0 : index
    %c0_3 = arith.constant 0 : index
    %2 = memref.load %arg2[%c0_2, %c0_3] : memref<2x4xf32, #tpu.memory_space<smem>>
    %3 = vector.broadcast %2 : f32 to vector<1x128xf32>
    %4 = arith.mulf %1, %3 : vector<1x128xf32>
    %c0_4 = arith.constant 0 : index
    %c0_5 = arith.constant 0 : index
    %5 = memref.load %arg3[%c0_4, %c0_5] : memref<1x4xf32, #tpu.memory_space<smem>>
    %6 = vector.broadcast %5 : f32 to vector<1x128xf32>
    %7 = arith.addf %4, %6 : vector<1x128xf32>
    %c1 = arith.constant 1 : index
    %c0_6 = arith.constant 0 : index
    %c0_7 = arith.constant 0 : index
    %8 = vector.load %arg1[%c1, %c0_6, %c0_7] : memref<2x1x128xf32, #tpu.memory_space<vmem>>, vector<1x1x128xf32>
    %9 = vector.shape_cast %8 : vector<1x1x128xf32> to vector<1x128xf32>
    %c1_8 = arith.constant 1 : index
    %c0_9 = arith.constant 0 : index
    %10 = memref.load %arg2[%c1_8, %c0_9] : memref<2x4xf32, #tpu.memory_space<smem>>
    %11 = vector.broadcast %10 : f32 to vector<1x128xf32>
    %12 = arith.mulf %9, %11 : vector<1x128xf32>
    %13 = arith.addf %7, %12 : vector<1x128xf32>
    %c0_10 = arith.constant 0 : index
    %c0_11 = arith.constant 0 : index
    %c0_12 = arith.constant 0 : index
    %14 = vector.load %arg4[%c0_10, %c0_11, %c0_12] : memref<4x1x128xf32, #tpu.memory_space<vmem>>, vector<1x1x128xf32>
    %15 = vector.shape_cast %14 : vector<1x1x128xf32> to vector<1x128xf32>
    %16 = vector.shape_cast %13 : vector<1x128xf32> to vector<1x1x128xf32>
    tpu.vector_store %arg4[%c0_10, %c0_11, %c0_12], %16 {strides = array<i32>} : memref<4x1x128xf32, #tpu.memory_space<vmem>>, vector<1x1x128xf32>,
    %c0_13 = arith.constant 0 : index
    %c0_14 = arith.constant 0 : index
    %c0_15 = arith.constant 0 : index
    %17 = vector.load %arg1[%c0_13, %c0_14, %c0_15] : memref<2x1x128xf32, #tpu.memory_space<vmem>>, vector<1x1x128xf32>
    %18 = vector.shape_cast %17 : vector<1x1x128xf32> to vector<1x128xf32>
    %c0_16 = arith.constant 0 : index
    %c1_17 = arith.constant 1 : index
    %19 = memref.load %arg2[%c0_16, %c1_17] : memref<2x4xf32, #tpu.memory_space<smem>>
    %20 = vector.broadcast %19 : f32 to vector<1x128xf32>
    %21 = arith.mulf %18, %20 : vector<1x128xf32>
    %c0_18 = arith.constant 0 : index
    %c1_19 = arith.constant 1 : index
    %22 = memref.load %arg3[%c0_18, %c1_19] : memref<1x4xf32, #tpu.memory_space<smem>>
    %23 = vector.broadcast %22 : f32 to vector<1x128xf32>
    %24 = arith.addf %21, %23 : vector<1x128xf32>
    %c1_20 = arith.constant 1 : index
    %c0_21 = arith.constant 0 : index
    %c0_22 = arith.constant 0 : index
    %25 = vector.load %arg1[%c1_20, %c0_21, %c0_22] : memref<2x1x128xf32, #tpu.memory_space<vmem>>, vector<1x1x128xf32>
    %26 = vector.shape_cast %25 : vector<1x1x128xf32> to vector<1x128xf32>
    %c1_23 = arith.constant 1 : index
    %c1_24 = arith.constant 1 : index
    %27 = memref.load %arg2[%c1_23, %c1_24] : memref<2x4xf32, #tpu.memory_space<smem>>
    %28 = vector.broadcast %27 : f32 to vector<1x128xf32>
    %29 = arith.mulf %26, %28 : vector<1x128xf32>
    %30 = arith.addf %24, %29 : vector<1x128xf32>
    %c1_25 = arith.constant 1 : index
    %c0_26 = arith.constant 0 : index
    %c0_27 = arith.constant 0 : index
    %31 = vector.load %arg4[%c1_25, %c0_26, %c0_27] : memref<4x1x128xf32, #tpu.memory_space<vmem>>, vector<1x1x128xf32>
    %32 = vector.shape_cast %31 : vector<1x1x128xf32> to vector<1x128xf32>
    %33 = vector.shape_cast %30 : vector<1x128xf32> to vector<1x1x128xf32>
    tpu.vector_store %arg4[%c1_25, %c0_26, %c0_27], %33 {strides = array<i32>} : memref<4x1x128xf32, #tpu.memory_space<vmem>>, vector<1x1x128xf32>,
    %c0_28 = arith.constant 0 : index
    %c0_29 = arith.constant 0 : index
    %c0_30 = arith.constant 0 : index
    %34 = vector.load %arg1[%c0_28, %c0_29, %c0_30] : memref<2x1x128xf32, #tpu.memory_space<vmem>>, vector<1x1x128xf32>
    %35 = vector.shape_cast %34 : vector<1x1x128xf32> to vector<1x128xf32>
    %c0_31 = arith.constant 0 : index
    %c2 = arith.constant 2 : index
    %36 = memref.load %arg2[%c0_31, %c2] : memref<2x4xf32, #tpu.memory_space<smem>>
    %37 = vector.broadcast %36 : f32 to vector<1x128xf32>
    %38 = arith.mulf %35, %37 : vector<1x128xf32>
    %c0_32 = arith.constant 0 : index
    %c2_33 = arith.constant 2 : index
    %39 = memref.load %arg3[%c0_32, %c2_33] : memref<1x4xf32, #tpu.memory_space<smem>>
    %40 = vector.broadcast %39 : f32 to vector<1x128xf32>
    %41 = arith.addf %38, %40 : vector<1x128xf32>
    %c1_34 = arith.constant 1 : index
    %c0_35 = arith.constant 0 : index
    %c0_36 = arith.constant 0 : index
    %42 = vector.load %arg1[%c1_34, %c0_35, %c0_36] : memref<2x1x128xf32, #tpu.memory_space<vmem>>, vector<1x1x128xf32>
    %43 = vector.shape_cast %42 : vector<1x1x128xf32> to vector<1x128xf32>
    %c1_37 = arith.constant 1 : index
    %c2_38 = arith.constant 2 : index
    %44 = memref.load %arg2[%c1_37, %c2_38] : memref<2x4xf32, #tpu.memory_space<smem>>
    %45 = vector.broadcast %44 : f32 to vector<1x128xf32>
    %46 = arith.mulf %43, %45 : vector<1x128xf32>
    %47 = arith.addf %41, %46 : vector<1x128xf32>
    %c2_39 = arith.constant 2 : index
    %c0_40 = arith.constant 0 : index
    %c0_41 = arith.constant 0 : index
    %48 = vector.load %arg4[%c2_39, %c0_40, %c0_41] : memref<4x1x128xf32, #tpu.memory_space<vmem>>, vector<1x1x128xf32>
    %49 = vector.shape_cast %48 : vector<1x1x128xf32> to vector<1x128xf32>
    %50 = vector.shape_cast %47 : vector<1x128xf32> to vector<1x1x128xf32>
    tpu.vector_store %arg4[%c2_39, %c0_40, %c0_41], %50 {strides = array<i32>} : memref<4x1x128xf32, #tpu.memory_space<vmem>>, vector<1x1x128xf32>,
    %c0_42 = arith.constant 0 : index
    %c0_43 = arith.constant 0 : index
    %c0_44 = arith.constant 0 : index
    %51 = vector.load %arg1[%c0_42, %c0_43, %c0_44] : memref<2x1x128xf32, #tpu.memory_space<vmem>>, vector<1x1x128xf32>
    %52 = vector.shape_cast %51 : vector<1x1x128xf32> to vector<1x128xf32>
    %c0_45 = arith.constant 0 : index
    %c3 = arith.constant 3 : index
    %53 = memref.load %arg2[%c0_45, %c3] : memref<2x4xf32, #tpu.memory_space<smem>>
    %54 = vector.broadcast %53 : f32 to vector<1x128xf32>
    %55 = arith.mulf %52, %54 : vector<1x128xf32>
    %c0_46 = arith.constant 0 : index
    %c3_47 = arith.constant 3 : index
    %56 = memref.load %arg3[%c0_46, %c3_47] : memref<1x4xf32, #tpu.memory_space<smem>>
    %57 = vector.broadcast %56 : f32 to vector<1x128xf32>
    %58 = arith.addf %55, %57 : vector<1x128xf32>
    %c1_48 = arith.constant 1 : index
    %c0_49 = arith.constant 0 : index
    %c0_50 = arith.constant 0 : index
    %59 = vector.load %arg1[%c1_48, %c0_49, %c0_50] : memref<2x1x128xf32, #tpu.memory_space<vmem>>, vector<1x1x128xf32>
    %60 = vector.shape_cast %59 : vector<1x1x128xf32> to vector<1x128xf32>
    %c1_51 = arith.constant 1 : index
    %c3_52 = arith.constant 3 : index
    %61 = memref.load %arg2[%c1_51, %c3_52] : memref<2x4xf32, #tpu.memory_space<smem>>
    %62 = vector.broadcast %61 : f32 to vector<1x128xf32>
    %63 = arith.mulf %60, %62 : vector<1x128xf32>
    %64 = arith.addf %58, %63 : vector<1x128xf32>
    %c3_53 = arith.constant 3 : index
    %c0_54 = arith.constant 0 : index
    %c0_55 = arith.constant 0 : index
    %65 = vector.load %arg4[%c3_53, %c0_54, %c0_55] : memref<4x1x128xf32, #tpu.memory_space<vmem>>, vector<1x1x128xf32>
    %66 = vector.shape_cast %65 : vector<1x1x128xf32> to vector<1x128xf32>
    %67 = vector.shape_cast %64 : vector<1x128xf32> to vector<1x1x128xf32>
    tpu.vector_store %arg4[%c3_53, %c0_54, %c0_55], %67 {strides = array<i32>} : memref<4x1x128xf32, #tpu.memory_space<vmem>>, vector<1x1x128xf32>,
    return
  }
  func.func @transform_0(%arg0: i32) -> (i32, i32, i32) {
    %c0_i32 = arith.constant 0 : i32
    %c0_i32_0 = arith.constant 0 : i32
    %c0_i32_1 = arith.constant 0 : i32
    return %c0_i32, %arg0, %c0_i32_0 : i32, i32, i32
  }
  func.func @transform_1(%arg0: i32) -> (i32, i32) {
    %c0_i32 = arith.constant 0 : i32
    %c0_i32_0 = arith.constant 0 : i32
    %c0_i32_1 = arith.constant 0 : i32
    return %c0_i32, %c0_i32_0 : i32, i32
  }
  func.func @transform_2(%arg0: i32) -> (i32, i32) {
    %c0_i32 = arith.constant 0 : i32
    %c0_i32_0 = arith.constant 0 : i32
    %c0_i32_1 = arith.constant 0 : i32
    return %c0_i32, %c0_i32_0 : i32, i32
  }
  func.func @transform_3(%arg0: i32) -> (i32, i32, i32) {
    %c0_i32 = arith.constant 0 : i32
    %c0_i32_0 = arith.constant 0 : i32
    %c0_i32_1 = arith.constant 0 : i32
    return %c0_i32, %arg0, %c0_i32_0 : i32, i32, i32
  }
}

</mosaic_0001>

<bundles_post_ra>
// kernel: blobs_forward.1
= control target key start
LH: loop header
LB: loop body
LE: loop exit
PB: predicated region body
PF: predicated region fallthrough
CT: control target
= control target key end

     0   :  { %8 = vsyncpa [#allocation4], 0  ;;  %s261_s0 = inlined_call_operand.vmem [shape: f32[2,1,128], index: 0, kind: input, shape index: {}]   ;;  %s262_s1 = inlined_call_operand.vmem [shape: f32[2,4], index: 1, kind: input, shape index: {}]   ;;  %s263_s2 = inlined_call_operand.vmem [shape: f32[1,4], index: 2, kind: input, shape index: {}]   ;;  %s264_s3 = inlined_call_operand.hbm [shape: f32[4,1,128], index: 3, kind: output, shape index: {}]  }
   0x1   :  { %9 = vsyncpa [#allocation6], 0 }
   0x2   :  { %10 = vsyncpa [#allocation3], 0  ;;  %s19_s14 = sshll.u32 %s262_s1, 4  ;;  %s29_s17 = sshll.u32 %s263_s2, 4  ;;  %s20_s14 = int_to_ptr.vmem [resolvable:$true] %s19_s14  ;;  %s30_s17 = int_to_ptr.vmem [resolvable:$true] %s29_s17 }
   0x3   :  { %s133_s18 = scalar_lea.vmem %s20_s14, 32  ;;  %p138_p1 = scmp.lt.s32.totalorder %s20_s14, %s20_s14 }
   0x4   :  { %p134_p0 = scmp.ne.s32.totalorder %s20_s14, %s133_s18  ;;  %p139_p2 = scmp.lt.s32.totalorder %s133_s18, %s133_s18 }
   0x6   :  { %p140_p3 = por %p139_p2, %p138_p1 }
   0x8   :  { %p141_p4 = pnand %p140_p3, %p134_p0 }
   0xa   :  { %144 = shalt.err (!%p141_p4)
}
   0xb   :  { %s185_s19 = smov [#allocation2]   ;;  %s145_s20 = scalar_lea.vmem %s30_s17, 16 }
   0xc   :  { %22 = dma.vmem_to_smem %s20_s14, 32, %s185_s19, [#allocation4]  }
   0xd   :  { %p146_p5 = scmp.ne.s32.totalorder %s30_s17, %s145_s20  ;;  %p150_p6 = scmp.lt.s32.totalorder %s30_s17, %s30_s17 }
   0xe   :  { %p151_p7 = scmp.lt.s32.totalorder %s145_s20, %s145_s20 }
  0x10   :  { %p152_p8 = por %p151_p7, %p150_p6 }
  0x12   :  { %p153_p9 = pnand %p152_p8, %p146_p5 }
  0x14   :  { %156 = shalt.err (!%p153_p9)
}
  0x15   :  { %s186_s1 = smov [#allocation5]  }
  0x16   :  { %32 = dma.vmem_to_smem %s30_s17, 16, %s186_s1, [#allocation6]  }
  0x17   :  { %179 = dma.done.wait [#allocation4], 32  }
  0x18   :  { %180 = vsyncadd [#allocation4], 4294967264 }
  0x19   :  { %181 = dma.done.wait [#allocation6], 16  }
  0x1a   :  { %182 = vsyncadd [#allocation6], 4294967280 }
  0x1b   :  { %39 = sfence }
  0x1c   :  { %s41_s2 = sld [smem:[#allocation2]]  ;;  %s116_s23 = sld [smem:[#allocation2 + $0x1]]  ;;  %v40_v0 = vld [vmem:[%s261_s0] sm:$0x1]  ;;  %v114_v1 = vld [vmem:[%s261_s0 + $0x1] sm:$0x1] }
  0x1d   :  { %s44_s21 = sld [smem:[#allocation5]]  ;;  %s216_s24 = sld [smem:[#allocation5 + $0x1]]  ;;  %v54_v4 = vld [vmem:[%s261_s0] sm:$0x1]  ;;  %v118_v7 = vld [vmem:[%s261_s0 + $0x1] sm:$0x1] }
  0x1e   :  { %s115_s22 = sld [smem:[#allocation2 + $0x80]]  ;;  %s119_s25 = sld [smem:[#allocation2 + $0x81]]  ;;  %v68_v8 = vld [vmem:[%s261_s0] sm:$0x1]  ;;  %v122_v12 = vld [vmem:[%s261_s0 + $0x1] sm:$0x1] }
  0x1f   :  { %s120_s26 = sld [smem:[#allocation2 + $0x2]]  ;;  %s124_s6 = sld [smem:[#allocation2 + $0x3]]  ;;  %v82_v17 = vld [vmem:[%s261_s0] sm:$0x1]  ;;  %v126_v22 = vld [vmem:[%s261_s0 + $0x1] sm:$0x1] }
  0x20   :  { %s221_s29 = sld [smem:[#allocation5 + $0x2]]  ;;  %s226_s7 = sld [smem:[#allocation5 + $0x3]] }
  0x21   :  { %s123_s30 = sld [smem:[#allocation2 + $0x82]]  ;;  %s127_s10 = sld [smem:[#allocation2 + $0x83]] }
  0x22   :  { %v42_v2 = vstv %s41_s2  ;;  %v56_v10 = vstv %s116_s23  ;;  %s187_s1 = smov [#allocation7]  }
  0x23   :  { %v45_v3 = vstv %s44_s21  ;;  %v43_v5 = vmul.f32 %v42_v2, %v40_v0  ;;  %v59_v11 = vstv %s216_s24  ;;  %v57_v14 = vmul.f32 %v56_v10, %v54_v4  ;;  %s101_s2 = sshll.u32 %s187_s1, 4  ;;  %s102_s2 = int_to_ptr.vmem [resolvable:$true] %s101_s2 }
  0x24   :  { %v50_v6 = vstv %s115_s22  ;;  %v63_v15 = vstv %s119_s25  ;;  %s157_s0 = scalar_lea.vmem %s102_s2, 64  ;;  %p162_p11 = scmp.lt.s32.totalorder %s102_s2, %s102_s2 }
  0x25   :  { %v51_v9 = vmul.f32 %v114_v1, %v50_v6  ;;  %v46_v13 = vadd.f32 %v45_v3, %v43_v5  ;;  %v70_v16 = vstv %s120_s26  ;;  %v64_v18 = vmul.f32 %v118_v7, %v63_v15  ;;  %p158_p10 = scmp.ne.s32.totalorder %s102_s2, %s157_s0  ;;  %p163_p12 = scmp.lt.s32.totalorder %s157_s0, %s157_s0 }
  0x26   :  { %v71_v19 = vmul.f32 %v70_v16, %v68_v8  ;;  %v73_v20 = vstv %s221_s29  ;;  %v60_v24 = vadd.f32 %v59_v11, %v57_v14  ;;  %v84_v26 = vstv %s124_s6 }
  0x27   :  { %v77_v21 = vstv %s123_s30  ;;  %v52_v23 = vadd.f32 %v51_v9, %v46_v13  ;;  %v85_v28 = vmul.f32 %v84_v26, %v82_v17  ;;  %v87_v29 = vstv %s226_s7  ;;  %p164_p13 = por %p163_p12, %p162_p11 }
  0x28   :  { %v78_v25 = vmul.f32 %v122_v12, %v77_v21  ;;  %v74_v27 = vadd.f32 %v73_v20, %v71_v19  ;;  %v91_v30 = vstv %s127_s10  ;;  %v65_v31 = vadd.f32 %v64_v18, %v60_v24 }
  0x29   :  { %53 = vst [vmem:[#allocation7] sm:$0x1] %v52_v23  ;;  %v92_v32 = vmul.f32 %v126_v22, %v91_v30  ;;  %v88_v34 = vadd.f32 %v87_v29, %v85_v28  ;;  %p165_p0 = pnand %p164_p13, %p158_p10 }
  0x2a   :  { %v79_v33 = vadd.f32 %v78_v25, %v74_v27  ;;  %67 = vst [vmem:[#allocation7 + $0x1] sm:$0x1] %v65_v31 }
  0x2b   :  { %v93_v35 = vadd.f32 %v92_v32, %v88_v34 }
  0x2c   :  { %81 = vst [vmem:[#allocation7 + $0x2] sm:$0x1] %v79_v33 }
  0x2d   :  { %95 = vst [vmem:[#allocation7 + $0x3] sm:$0x1] %v93_v35 }
  0x2e   :  { %168 = shalt.err (!%p165_p0)
}
  0x2f   :  { %s169_s23 = scalar_lea.hbm %s264_s3, 64 }
  0x30   :  { %p170_p1 = scmp.ne.s32.totalorder %s264_s3, %s169_s23  ;;  %p173_p2 = scmp.lt.u32.totalorder %s169_s23, %s264_s3 }
  0x32   :  { %p175_p3 = pnand %p173_p2, %p170_p1 }
  0x34   :  { %178 = shalt.err (!%p175_p3)
}
  0x35   :  { %s188_s28 = smov 16   ;;  %s189_s29 = smov 1  }
  0x36   :  { %107 = dma.vmem_to_hbm [thread:$0]  %s102_s2, 64, %s264_s3, [#allocation3], %s188_s28, %s188_s28, %s189_s29  }
  0x37   :  { %183 = dma.done.wait [#allocation3], 64  }
  0x38   :  { %184 = vsyncadd [#allocation3], 4294967232 }
  0x39   :  { %111 = vsyncpa [#allocation3], 1 }
  0x3a   :  { %112 = vsyncpa [#allocation4], 1 }
  0x3b   :  { %113 = vsyncpa [#allocation6], 1 }

</bundles_post_ra>
